<compile_context>
chip_gen: v7x
topology: tpu7x:2x2x1
jax: 0.10.0
libtpu: 0.0.40
codegen_flags: <defaults>
</compile_context>

<pallas_src>
import functools

import jax
import jax.numpy as jnp
from jax.experimental import pallas as pl
from jax.experimental.pallas import tpu as pltpu


def _round_up(x, m):
    return (x + m - 1) // m * m


# -----------------------------------------------------------------------------
# Pallas kernel: fused VGAE encoder, one grid step per branch
# -----------------------------------------------------------------------------
def _frn_vgae_kernel(adj_ref, x_ref, w1_ref, wcat_ref, eps_ref, out_ref, *,
                     hidden2):
    adj = adj_ref[0]                                         # (N, N)   bf16
    x = x_ref[0]                                             # (N, F)   bf16

    # Layer 1: h = relu(A @ (X @ W1)); f32 accumulation on the MXU.
    xw = jnp.dot(x, w1_ref[0], preferred_element_type=jnp.float32)
    h = jnp.maximum(
        jnp.dot(adj, xw.astype(jnp.bfloat16),
                preferred_element_type=jnp.float32), 0.0)     # (N, H1) f32

    # Fused heads: [mu | logstd] = A @ (h @ [W_mu | W_logstd]).
    hm = jnp.dot(h.astype(jnp.bfloat16), wcat_ref[0],
                 preferred_element_type=jnp.float32)          # (N, 2*H2)
    heads = jnp.dot(adj, hm.astype(jnp.bfloat16),
                    preferred_element_type=jnp.float32)       # (N, 2*H2)

    mu = heads[:, :hidden2]
    logstd = heads[:, hidden2:]
    # Reparameterization (logstd left unclamped to match the reference VGAE).
    z = mu + eps_ref[0] * jnp.exp(logstd)

    # Lane-packed output slab [mu | logstd | z] -> one store / output DMA.
    out_ref[0] = jnp.concatenate([heads, z], axis=-1)


# -----------------------------------------------------------------------------
# Wrapper: pad/stack both branches, single pallas_call, unpack outputs
# -----------------------------------------------------------------------------
def frn_forward(graph_lnc, xl0, graph_pro, xp0, params, eps_l, eps_p):
    l_w1, l_wmu, l_wstd, p_w1, p_wmu, p_wstd = params
    hidden1 = l_w1.shape[1]
    hidden2 = l_wmu.shape[1]
    n_l, f_l = xl0.shape
    n_p, f_p = xp0.shape

    n_pad = _round_up(max(n_l, n_p), 16)     # bf16 sublane-friendly
    f_pad = max(f_l, f_p)

    def pad2(a, rows, cols):
        return jnp.pad(a, ((0, rows - a.shape[0]), (0, cols - a.shape[1])))

    adj = jnp.stack([pad2(graph_lnc, n_pad, n_pad),
                     pad2(graph_pro, n_pad, n_pad)]).astype(jnp.bfloat16)
    x = jnp.stack([pad2(xl0, n_pad, f_pad),
                   pad2(xp0, n_pad, f_pad)]).astype(jnp.bfloat16)
    w1 = jnp.stack([pad2(l_w1, f_pad, hidden1),
                    pad2(p_w1, f_pad, hidden1)]).astype(jnp.bfloat16)
    # Fused mu/logstd head weights, hoisted out of the kernel.
    wcat = jnp.stack([jnp.concatenate([l_wmu, l_wstd], axis=1),
                      jnp.concatenate([p_wmu, p_wstd], axis=1)]
                     ).astype(jnp.bfloat16)
    eps = jnp.stack([pad2(eps_l, n_pad, hidden2),
                     pad2(eps_p, n_pad, hidden2)]).astype(jnp.float32)

    out = pl.pallas_call(
        functools.partial(_frn_vgae_kernel, hidden2=hidden2),
        out_shape=jax.ShapeDtypeStruct((2, n_pad, 3 * hidden2), jnp.float32),
        grid=(2,),
        in_specs=[
            pl.BlockSpec((1, n_pad, n_pad), lambda b: (b, 0, 0)),
            pl.BlockSpec((1, n_pad, f_pad), lambda b: (b, 0, 0)),
            pl.BlockSpec((1, f_pad, hidden1), lambda b: (b, 0, 0)),
            pl.BlockSpec((1, hidden1, 2 * hidden2), lambda b: (b, 0, 0)),
            pl.BlockSpec((1, n_pad, hidden2), lambda b: (b, 0, 0)),
        ],
        out_specs=pl.BlockSpec((1, n_pad, 3 * hidden2), lambda b: (b, 0, 0)),
        compiler_params=pltpu.CompilerParams(
            dimension_semantics=("parallel",),
            vmem_limit_bytes=48 * 1024 * 1024),
    )(adj, x, w1, wcat, eps)

    def unpack(row, n):
        return (out[row, :n, :hidden2],
                out[row, :n, hidden2:2 * hidden2],
                out[row, :n, 2 * hidden2:])

    hl, stdl, xl = unpack(0, n_l)
    hp, stdp, xp = unpack(1, n_p)
    return hl, stdl, xl, hp, stdp, xp


# -----------------------------------------------------------------------------
# Glue: deterministic parameter init and graph normalization (plain JAX)
# -----------------------------------------------------------------------------
def glorot(key, shape):
    limit = jnp.sqrt(6.0 / (shape[0] + shape[1]))
    return jax.random.uniform(key, shape, jnp.float32, -limit, limit)


def normalized_adjacency(key, n):
    """Random symmetric graph with self-loops, D^{-1/2} (A+I) D^{-1/2}."""
    a = (jax.random.uniform(key, (n, n)) > 0.7).astype(jnp.float32)
    a = jnp.maximum(a, a.T)
    a = a + jnp.eye(n, dtype=jnp.float32)
    d_inv_sqrt = 1.0 / jnp.sqrt(a.sum(axis=1))
    return a * d_inv_sqrt[:, None] * d_inv_sqrt[None, :]


class FRNPallas:
    """FRN: two independent VGAE encoders (lncRNA branch, protein branch)."""

    def __init__(self, key, feat_l, feat_p, hidden1=256, hidden2=32):
        ks = jax.random.split(key, 6)
        # lncRNA-branch VGAE params
        self.l_w1 = glorot(ks[0], (feat_l, hidden1))
        self.l_wmu = glorot(ks[1], (hidden1, hidden2))
        self.l_wstd = glorot(ks[2], (hidden1, hidden2))
        # protein-branch VGAE params
        self.p_w1 = glorot(ks[3], (feat_p, hidden1))
        self.p_wmu = glorot(ks[4], (hidden1, hidden2))
        self.p_wstd = glorot(ks[5], (hidden1, hidden2))
        self.hidden2 = hidden2

    def params(self):
        return (self.l_w1, self.l_wmu, self.l_wstd,
                self.p_w1, self.p_wmu, self.p_wstd)

    def sample_eps(self, noise_key, n_l, n_p):
        kl, kp = jax.random.split(noise_key)
        eps_l = jax.random.normal(kl, (n_l, self.hidden2), jnp.float32)
        eps_p = jax.random.normal(kp, (n_p, self.hidden2), jnp.float32)
        return eps_l, eps_p

    def __call__(self, graph_lnc, xl0, graph_pro, xp0, noise_key):
        eps_l, eps_p = self.sample_eps(noise_key, xl0.shape[0], xp0.shape[0])
        return frn_forward(graph_lnc, xl0, graph_pro, xp0, self.params(),
                           eps_l, eps_p)


def _vgae_ref(adj, x, w1, wmu, wstd, eps):
    """Pure-JAX f32 reference for the canonical VGAE encoder."""
    h = jax.nn.relu(adj @ (x @ w1))
    mu = adj @ (h @ wmu)
    logstd = adj @ (h @ wstd)
    z = mu + eps * jnp.exp(logstd)
    return mu, logstd, z


if __name__ == "__main__":
    key = jax.random.PRNGKey(0)
    k_graph_l, k_graph_p, k_feat_l, k_feat_p, k_params, k_noise = \
        jax.random.split(key, 6)

    # Small synthetic shapes consistent with the module:
    #   lncRNA graph : 16 nodes, 24-dim features
    #   protein graph: 24 nodes, 32-dim features
    #   VGAE hidden1 = 256, args.hidden = 32
    n_lnc, feat_l = 16, 24
    n_pro, feat_p = 24, 32

    graph_lnc = normalized_adjacency(k_graph_l, n_lnc)
    graph_pro = normalized_adjacency(k_graph_p, n_pro)
    xl0 = jax.random.normal(k_feat_l, (n_lnc, feat_l), jnp.float32)
    xp0 = jax.random.normal(k_feat_p, (n_pro, feat_p), jnp.float32)

    model = FRNPallas(k_params, feat_l, feat_p, hidden1=256, hidden2=32)
    outs = model(graph_lnc, xl0, graph_pro, xp0, k_noise)
    outs = jax.block_until_ready(outs)

    hl, stdl, xl, hp, stdp, xp = outs
    assert hl.shape == (n_lnc, 32) and stdl.shape == (n_lnc, 32)
    assert xl.shape == (n_lnc, 32)
    assert hp.shape == (n_pro, 32) and stdp.shape == (n_pro, 32)
    assert xp.shape == (n_pro, 32)
    assert all(bool(jnp.all(jnp.isfinite(o))) for o in outs)

    # f32 reference check (loose tolerance: kernel uses bf16 MXU inputs).
    eps_l, eps_p = model.sample_eps(k_noise, n_lnc, n_pro)
    ref_l = _vgae_ref(graph_lnc, xl0, model.l_w1, model.l_wmu, model.l_wstd,
                      eps_l)
    ref_p = _vgae_ref(graph_pro, xp0, model.p_w1, model.p_wmu, model.p_wstd,
                      eps_p)
    for got, want in zip((hl, stdl, xl, hp, stdp, xp), ref_l + ref_p):
        assert bool(jnp.allclose(got, want, rtol=1e-1, atol=1e-1)), \
            "Pallas output diverged from f32 reference"

    print("KERNEL_OK")
</pallas_src>

<mosaic_0001>
module attributes {stable_mosaic.version = 11 : i64} {
  func.func @_frn_vgae_kernel(%arg0: i32, %arg1: memref<1x32x32xbf16, #tpu.memory_space<vmem>>, %arg2: memref<1x32x32xbf16, #tpu.memory_space<vmem>>, %arg3: memref<1x32x256xbf16, #tpu.memory_space<vmem>>, %arg4: memref<1x256x64xbf16, #tpu.memory_space<vmem>>, %arg5: memref<1x32x32xf32, #tpu.memory_space<vmem>>, %arg6: memref<1x32x96xf32, #tpu.memory_space<vmem>>) attributes {dimension_semantics = [#tpu.dimension_semantics<parallel>], iteration_bounds = array<i64: 2>, scalar_prefetch = 0 : i64, scratch_operands = 0 : i64, tpu.core_type = #tpu.core_type<tc>, window_params = [{transform_indices = @transform_0, window_bounds = array<i64: 1, 32, 32>}, {transform_indices = @transform_1, window_bounds = array<i64: 1, 32, 32>}, {transform_indices = @transform_2, window_bounds = array<i64: 1, 32, 256>}, {transform_indices = @transform_3, window_bounds = array<i64: 1, 256, 64>}, {transform_indices = @transform_4, window_bounds = array<i64: 1, 32, 32>}, {transform_indices = @transform_5, window_bounds = array<i64: 1, 32, 96>}]} {
    %c0 = arith.constant 0 : index
    %c0_0 = arith.constant 0 : index
    %c0_1 = arith.constant 0 : index
    %0 = vector.load %arg1[%c0, %c0_0, %c0_1] : memref<1x32x32xbf16, #tpu.memory_space<vmem>>, vector<1x32x32xbf16>
    %1 = vector.shape_cast %0 : vector<1x32x32xbf16> to vector<32x32xbf16>
    %c0_2 = arith.constant 0 : index
    %c0_3 = arith.constant 0 : index
    %c0_4 = arith.constant 0 : index
    %2 = vector.load %arg2[%c0_2, %c0_3, %c0_4] : memref<1x32x32xbf16, #tpu.memory_space<vmem>>, vector<1x32x32xbf16>
    %3 = vector.shape_cast %2 : vector<1x32x32xbf16> to vector<32x32xbf16>
    %c0_5 = arith.constant 0 : index
    %c0_6 = arith.constant 0 : index
    %c0_7 = arith.constant 0 : index
    %4 = vector.load %arg3[%c0_5, %c0_6, %c0_7] : memref<1x32x256xbf16, #tpu.memory_space<vmem>>, vector<1x32x256xbf16>
    %5 = vector.shape_cast %4 : vector<1x32x256xbf16> to vector<32x256xbf16>
    %cst = arith.constant dense<0.000000e+00> : vector<32x256xf32>
    %6 = tpu.matmul %3, %5, %cst {dimension_numbers = #tpu.dot_dimension_numbers<[1], [0], [0], [1], [0, 0, 1, 1], [], []>} : vector<32x32xbf16>, vector<32x256xbf16>, vector<32x256xf32> -> vector<32x256xf32>
    %7 = arith.truncf %6 : vector<32x256xf32> to vector<32x256xbf16>
    %cst_8 = arith.constant dense<0.000000e+00> : vector<32x256xf32>
    %8 = tpu.matmul %1, %7, %cst_8 {dimension_numbers = #tpu.dot_dimension_numbers<[1], [0], [0], [1], [0, 0, 1, 1], [], []>} : vector<32x32xbf16>, vector<32x256xbf16>, vector<32x256xf32> -> vector<32x256xf32>
    %cst_9 = arith.constant 0.000000e+00 : f32
    %9 = vector.broadcast %cst_9 : f32 to vector<32x256xf32>
    %10 = arith.maximumf %8, %9 : vector<32x256xf32>
    %11 = arith.truncf %10 : vector<32x256xf32> to vector<32x256xbf16>
    %c0_10 = arith.constant 0 : index
    %c0_11 = arith.constant 0 : index
    %c0_12 = arith.constant 0 : index
    %12 = vector.load %arg4[%c0_10, %c0_11, %c0_12] : memref<1x256x64xbf16, #tpu.memory_space<vmem>>, vector<1x256x64xbf16>
    %13 = vector.shape_cast %12 : vector<1x256x64xbf16> to vector<256x64xbf16>
    %cst_13 = arith.constant dense<0.000000e+00> : vector<32x64xf32>
    %14 = tpu.matmul %11, %13, %cst_13 {dimension_numbers = #tpu.dot_dimension_numbers<[1], [0], [0], [1], [0, 0, 1, 1], [], []>} : vector<32x256xbf16>, vector<256x64xbf16>, vector<32x64xf32> -> vector<32x64xf32>
    %15 = arith.truncf %14 : vector<32x64xf32> to vector<32x64xbf16>
    %cst_14 = arith.constant dense<0.000000e+00> : vector<32x64xf32>
    %16 = tpu.matmul %1, %15, %cst_14 {dimension_numbers = #tpu.dot_dimension_numbers<[1], [0], [0], [1], [0, 0, 1, 1], [], []>} : vector<32x32xbf16>, vector<32x64xbf16>, vector<32x64xf32> -> vector<32x64xf32>
    %17 = vector.extract_strided_slice %16 {offsets = [0, 0], sizes = [32, 32], strides = [1, 1]} : vector<32x64xf32> to vector<32x32xf32>
    %18 = vector.extract_strided_slice %16 {offsets = [0, 32], sizes = [32, 32], strides = [1, 1]} : vector<32x64xf32> to vector<32x32xf32>
    %c0_15 = arith.constant 0 : index
    %c0_16 = arith.constant 0 : index
    %c0_17 = arith.constant 0 : index
    %19 = vector.load %arg5[%c0_15, %c0_16, %c0_17] : memref<1x32x32xf32, #tpu.memory_space<vmem>>, vector<1x32x32xf32>
    %20 = vector.shape_cast %19 : vector<1x32x32xf32> to vector<32x32xf32>
    %21 = math.exp %18 : vector<32x32xf32>
    %22 = arith.mulf %20, %21 : vector<32x32xf32>
    %23 = arith.addf %17, %22 : vector<32x32xf32>
    %24 = tpu.concatenate %16, %23 in 1 : vector<32x64xf32>, vector<32x32xf32> -> vector<32x96xf32>
    %c0_18 = arith.constant 0 : index
    %c0_19 = arith.constant 0 : index
    %c0_20 = arith.constant 0 : index
    %25 = vector.load %arg6[%c0_18, %c0_19, %c0_20] : memref<1x32x96xf32, #tpu.memory_space<vmem>>, vector<1x32x96xf32>
    %26 = vector.shape_cast %25 : vector<1x32x96xf32> to vector<32x96xf32>
    %27 = vector.shape_cast %24 : vector<32x96xf32> to vector<1x32x96xf32>
    tpu.vector_store %arg6[%c0_18, %c0_19, %c0_20], %27 {strides = array<i32>} : memref<1x32x96xf32, #tpu.memory_space<vmem>>, vector<1x32x96xf32>,
    return
  }
  func.func @transform_0(%arg0: i32) -> (i32, i32, i32) {
    %c0_i32 = arith.constant 0 : i32
    %c0_i32_0 = arith.constant 0 : i32
    %c0_i32_1 = arith.constant 0 : i32
    return %arg0, %c0_i32, %c0_i32_0 : i32, i32, i32
  }
  func.func @transform_1(%arg0: i32) -> (i32, i32, i32) {
    %c0_i32 = arith.constant 0 : i32
    %c0_i32_0 = arith.constant 0 : i32
    %c0_i32_1 = arith.constant 0 : i32
    return %arg0, %c0_i32, %c0_i32_0 : i32, i32, i32
  }
  func.func @transform_2(%arg0: i32) -> (i32, i32, i32) {
    %c0_i32 = arith.constant 0 : i32
    %c0_i32_0 = arith.constant 0 : i32
    %c0_i32_1 = arith.constant 0 : i32
    return %arg0, %c0_i32, %c0_i32_0 : i32, i32, i32
  }
  func.func @transform_3(%arg0: i32) -> (i32, i32, i32) {
    %c0_i32 = arith.constant 0 : i32
    %c0_i32_0 = arith.constant 0 : i32
    %c0_i32_1 = arith.constant 0 : i32
    return %arg0, %c0_i32, %c0_i32_0 : i32, i32, i32
  }
  func.func @transform_4(%arg0: i32) -> (i32, i32, i32) {
    %c0_i32 = arith.constant 0 : i32
    %c0_i32_0 = arith.constant 0 : i32
    %c0_i32_1 = arith.constant 0 : i32
    return %arg0, %c0_i32, %c0_i32_0 : i32, i32, i32
  }
  func.func @transform_5(%arg0: i32) -> (i32, i32, i32) {
    %c0_i32 = arith.constant 0 : i32
    %c0_i32_0 = arith.constant 0 : i32
    %c0_i32_1 = arith.constant 0 : i32
    return %arg0, %c0_i32, %c0_i32_0 : i32, i32, i32
  }
}

</mosaic_0001>

<bundles_post_ra>
// kernel: tpu_custom_call.1
= control target key start
LH: loop header
LB: loop body
LE: loop exit
PB: predicated region body
PF: predicated region fallthrough
CT: control target
= control target key end

     0   :  { %10 = vsyncpa [#allocation3], 0  ;;  %s1343_s0 = inlined_call_operand.vmem [shape: bf16[2,32,32], index: 0, kind: input, shape index: {}]   ;;  %s1344_s1 = inlined_call_operand.vmem [shape: bf16[2,32,32], index: 1, kind: input, shape index: {}]   ;;  %s1345_s2 = inlined_call_operand.vmem [shape: bf16[2,32,256], index: 2, kind: input, shape index: {}]   ;;  %s1346_s3 = inlined_call_operand.vmem [shape: bf16[2,256,64], index: 3, kind: input, shape index: {}]   ;;  %s1347_s4 = inlined_call_operand.vmem [shape: f32[2,32,32], index: 4, kind: input, shape index: {}]   ;;  %s1348_s5 = inlined_call_operand.hbm [shape: f32[2,32,96], index: 5, kind: output, shape index: {}]  }
   0x1   :  { %12 = vsyncpa [#allocation3 + $0x1], 0  ;;  %s1179_s18 = smov 0   ;;  %s1181_s19 = smov 0  }
   0x2   :  { %s1183_s20 = smov 0   ;;  %s1185_s21 = smov 0  }
   0x3 LB: > { %s1200_s22 = sadd.s32 4294967295, %s1141_s21   ;;  %s905_s23 = sadd.s32 4294967294, %s1141_s21   ;;  %s1141_s21 = sphi %s1185_s21, %s1354_s21   ;;  %s1137_s20 = sphi %s1183_s20, %s1353_s20   ;;  %s1133_s19 = sphi %s1181_s19, %s1352_s19   ;;  %s1129_s18 = sphi %s1179_s18, %s1351_s18  }
   0x4   : > { %s1204_s24 = sadd.s32 1, %s1141_s21   ;;  %s155_s25 = sadd.s32 1, %s1137_s20 }
   0x5   : > { %s152_s26 = ssub.s32 %s1141_s21, %s1204_s24  ;;  %p165_p0 = scmp.ne.s32.totalorder %s1137_s20, %s1133_s19 }
   0x6   : > { %p153_p1 = scmp.eq.s32.totalorder %s152_s26, 0  ;;  %p166_p2 = scmp.eq.s32.totalorder %s1200_s22, 1 }
   0x7   : > { %p171_p3 = scmp.ne.s32.totalorder %s1133_s19, %s1129_s18  ;;  %p172_p4 = scmp.eq.s32.totalorder %s905_s23, 1 }
   0x8   : > { %s1215_s27 = scalar_select %p153_p1, %s1137_s20, %s155_s25  }
   0x9   : > { %p1217_p5 = por %p166_p2, %p165_p0  ;;  %p1221_p6 = por %p172_p4, %p171_p3 }
   0xa   : > { %p908_p7 = scmp.ge.s32.totalorder %s1141_s21, 1  ;;  %p230_p8 = scmp.lt.s32.totalorder %s1141_s21, 3 }
   0xc   : > { %p231_p9 = pnand %p908_p7, %p230_p8 }
   0xd   : > { %p278_p10 = scmp.lt.s32.totalorder (!%p231_p9), %s1200_s22, 1  ;;  %v1143_v0 = vmov (!%p231_p9), 0   ;;  %vm346_vm0 = vcmask (!%p231_p9), 261120   ;;  %s1144_s7 = smov (!%p231_p9), 96   ;;  %vm771_vm1 = vcmask (!%p231_p9), 523264   ;;  %vm776_vm2 = vcmask (!%p231_p9), 785408  }
   0xe   : > { %234 = sbr.rel (%p231_p9) target bundleno = 1198 (0x4ae), region = 40  ;;  %385 = vmatprep.mubr.bf16.mxu1 (!%p231_p9), %v1143_v0  ;;  %s1145_s11 = smov (!%p231_p9), 64  }
   0xf   : > { %s1146_s25 = smov (!%p231_p9), [#allocation2]  }
  0x15   : > { %s1230_s30 = scalar_select %p278_p10, %s1200_s22, 1 }
  0x17   : > { %s957_s6 = sshll.u32 %s1230_s30, 5  ;;  %s955_s10 = sshll.u32 %s1230_s30, 4 }
  0x18   : > { %s292_s9 = scalar_lea.vmem %s1345_s2, %s957_s6  ;;  %s287_s13 = scalar_lea.vmem %s1344_s1, %s955_s10 }
  0x19   : > { %v1045_v1 = vld [vmem:[%s292_s9 + $0x4] ss:$8 sps:$4 sm:$0xff]   ;;  %v1047_v2 = vld [vmem:[%s292_s9] ss:$8 sps:$4 sm:$0xff]   ;;  %s958_s14 = sshll.u32 %s1230_s30, 7  ;;  %s1246_s17 = scalar_lea.vmem %s1343_s0, %s955_s10 }
  0x1a   : > { %353 = vmatprep.subr.bf16.mxu1 %v1045_v1  ;;  %v1048_v3 = vld [vmem:[%s292_s9 + $0x14] ss:$8 sps:$4 sm:$0xff]   ;;  %v1050_v4 = vld [vmem:[%s292_s9 + $0x10] ss:$8 sps:$4 sm:$0xff]   ;;  %v1051_v5 = vld [vmem:[%s287_s13] sm:$0xff]   ;;  %s1251_s26 = scalar_lea.vmem %s1346_s3, %s958_s14  ;;  %s302_s10 = scalar_lea.vmem %s1347_s4, %s957_s6 }
  0x1b   : > { %354 = vmatpush1.bf16.msra.mxu1 %v1047_v2  ;;  %v1052_v6 = vld [vmem:[%s287_s13 + $0x8] sm:$0xff]   ;;  %v1055_v7 = vld [vmem:[%s1251_s26 + $0x40] sm:$0xff]   ;;  %v1059_v11 = vld [vmem:[%s1251_s26 + $0x50] sm:$0xff]   ;;  %s275_s30 = sand.u32 1, %s1133_s19   ;;  %s960_s14 = sshll.u32 %s1200_s22, 9 }
  0x1c   : > { %355 = vmatprep.subr.bf16.mxu1 %v1048_v3  ;;  %v1056_v8 = vld [vmem:[%s1251_s26] sm:$0xff]   ;;  %v1057_v9 = vld [vmem:[%s1251_s26 + $0x48] sm:$0xff]   ;;  %961 = vmatprep.subr.bf16.mxu0 %v1055_v7  ;;  %v1060_v12 = vld [vmem:[%s1251_s26 + $0x10] sm:$0xff]   ;;  %s909_s6 = sshll.u32 %s275_s30, 5  ;;  %s1302_s22 = scalar_lea.sflag [#allocation3], %s275_s30 }
  0x1d   : > { %962 = vmatpush3.bf16.msra.mxu0 %v1056_v8  ;;  %v1058_v10 = vld [vmem:[%s1251_s26 + $0x8] sm:$0xff]   ;;  %v1061_v13 = vld [vmem:[%s1251_s26 + $0x58] sm:$0xff]   ;;  %v1063_v15 = vld [vmem:[%s1251_s26 + $0x60] sm:$0xff]   ;;  %s277_s12 = scalar_lea.vmem [#allocation2], %s909_s6 }
  0x1e   : > { %963 = vmatprep.subr.bf16.mxu0 %v1057_v9  ;;  %v1062_v14 = vld [vmem:[%s1251_s26 + $0x18] sm:$0xff]   ;;  %v1064_v16 = vld [vmem:[%s1251_s26 + $0x20] sm:$0xff]   ;;  %v1065_v17 = vld [vmem:[%s1251_s26 + $0x68] sm:$0xff]   ;;  %s795_s13 = sshll.u32 %s277_s12, 4  ;;  %s1293_s13 = int_to_ptr.vmem [resolvable:$true] %s795_s13 }
  0x1f   : > { %356 = vmatpush1.bf16.msra.mxu1 %v1050_v4  ;;  %v1066_v18 = vld [vmem:[%s1251_s26 + $0x28] sm:$0xff]   ;;  %v1053_v31 = vld [vmem:[%s1246_s17] sm:$0xff]   ;;  %v1067_v33 = vld [vmem:[%s1251_s26 + $0x70] sm:$0xff]   ;;  %s1079_s23 = scalar_lea.vmem %s1293_s13, 512 }
  0x20   : > { %v1054_v32 = vld [vmem:[%s1246_s17 + $0x8] sm:$0xff]   ;;  %v1068_v34 = vld [vmem:[%s1251_s26 + $0x30] sm:$0xff]   ;;  %v1069_v35 = vld [vmem:[%s1251_s26 + $0x78] sm:$0xff]   ;;  %s1298_s17 = scalar_lea.hbm %s1348_s5, %s960_s14  ;;  %p1080_p11 = scmp.ne.s32.totalorder %s1293_s13, %s1079_s23 }
  0x21   : > { %964 = vmatpush3.bf16.msra.mxu0 %v1058_v10  ;;  %v1070_v36 = vld [vmem:[%s1251_s26 + $0x38] sm:$0xff]   ;;  %s1083_s26 = sshll.u32 %s1146_s25, 4  ;;  %s1084_s26 = int_to_ptr.vmem [resolvable:$false] %s1083_s26 }
  0x22   : > { %926 = vmatmul.mubr.msk.bf16.vlgmr.msra.gmra.mrb[0].mxu1 %vm346_vm0, %v1051_v5  ;;  %965 = vmatprep.subr.bf16.mxu0 %v1059_v11  ;;  %p1081_p12 = pnand %p1080_p11, %p1217_p5  ;;  %p1086_p0 = scmp.lt.s32.totalorder %s1293_s13, %s1084_s26 }
  0x23   : > { %395 = vmatprep.mubr.bf16.mxu1 %v1143_v0 }
  0x24   : > { %p1082_p13 = pneg %p1081_p12 }
  0x25   : > { %966 = vmatpush3.bf16.msra.mxu0 %v1060_v12 }
  0x26   : > { %967 = vmatprep.subr.bf16.mxu0 %v1061_v13 }
  0x29   : > { %968 = vmatpush3.bf16.msra.mxu0 %v1062_v14 }
  0x2a   : > { %927 = vmatmul.mubr.msk.bf16.gmra.mrb[4].mxu1 %vm346_vm0, %v1052_v6  ;;  %969 = vmatprep.subr.bf16.mxu0 %v1063_v15 }
  0x2b   : > { %458 = vmatprep.mubr.bf16.mxu1 %v1143_v0 }
  0x2d   : > { %970 = vmatpush3.bf16.msra.mxu0 %v1064_v16 }
  0x2e   : > { %971 = vmatprep.subr.bf16.mxu0 %v1065_v17 }
  0x31   : > { %972 = vmatpush3.bf16.msra.mxu0 %v1066_v18 }
  0x32   : > { %973 = vmatprep.subr.bf16.mxu0 %v1067_v33 }
  0x35   : > { %974 = vmatpush3.bf16.msra.mxu0 %v1068_v34 }
  0x36   : > { %975 = vmatprep.subr.bf16.mxu0 %v1069_v35 }
  0x39   : > { %976 = vmatpush3.bf16.msra.mxu0 %v1070_v36 }
  0xf5   : > { %v387_v19 = vpop.f32.mrb[0].mxu1 }
  0xf6   : > { %v389_v20 = vpop.f32.mrb[1].mxu1 }
  0xf7   : > { %v391_v21 = vpop.f32.mrb[2].mxu1 }
  0xf8   : > { %v406_v22 = vpack.c.bf16 %v391_v21, %v387_v19  ;;  %v393_v23 = vpop.f32.mrb[3].mxu1  ;;  %v719_v19 = vld [vmem:[%s302_s10] sm:$0xff]  ;;  %v721_v21 = vld [vmem:[%s302_s10 + $0x10] sm:$0xff] }
  0xf9   : > { %v407_v24 = vpack.c.bf16 %v393_v23, %v389_v20 }
  0xfb   : > { %426 = vmatprep.subr.bf16.mxu1 %v407_v24  ;;  %v720_v24 = vld [vmem:[%s302_s10 + $0x8] sm:$0xff] }
  0xfc   : > { %427 = vmatpush1.bf16.msra.mxu1 %v406_v22 }
  0xfd   : > { %v397_v25 = vpop.f32.mrb[4].mxu1 }
  0xfe   : > { %v399_v26 = vpop.f32.mrb[5].mxu1 }
  0xff   : > { %v401_v27 = vpop.f32.mrb[6].mxu1 }
 0x100   : > { %v408_v28 = vpack.c.bf16 %v401_v27, %v397_v25  ;;  %v403_v29 = vpop.f32.mrb[7].mxu1  ;;  %v722_v27 = vld [vmem:[%s302_s10 + $0x18] sm:$0xff] }
 0x101   : > { %v409_v30 = vpack.c.bf16 %v403_v29, %v399_v26 }
 0x103   : > { %428 = vmatprep.subr.bf16.mxu1 %v409_v30 }
 0x104   : > { %429 = vmatpush1.bf16.msra.mxu1 %v408_v28 }
 0x107   : > { %930 = vmatmul.mubr.msk.bf16.vlgmr.msra.gmra.mrb[8].mxu1 %vm346_vm0, %v1053_v31 }
 0x108   : > { %468 = vmatprep.mubr.bf16.mxu1 %v1143_v0 }
 0x10f   : > { %931 = vmatmul.mubr.msk.bf16.gmra.mrb[12].mxu1 %vm346_vm0, %v1054_v32 }
 0x110   : > { %997 = vmatprep.mubr.msk.bf16.mxu1 %vm346_vm0, %v1053_v31 }
 0x1da   : > { %v460_v37 = vpop.f32.mrb[8].mxu1 }
 0x1db   : > { %v462_v38 = vpop.f32.mrb[9].mxu1  ;;  %v479_v40 = vmax.f32 %v460_v37, 0.0 }
 0x1dc   : > { %v464_v39 = vpop.f32.mrb[10].mxu1  ;;  %v480_v43 = vmax.f32 %v462_v38, 0.0 }
 0x1dd   : > { %v481_v41 = vmax.f32 %v464_v39, 0.0  ;;  %v466_v42 = vpop.f32.mrb[11].mxu1 }
 0x1de   : > { %v482_v44 = vmax.f32 %v466_v42, 0.0 }
 0x1df   : > { %v487_v45 = vpack.c.bf16 %v481_v41, %v479_v40 }
 0x1e0   : > { %v488_v46 = vpack.c.bf16 %v482_v44, %v480_v43 }
 0x1e2   : > { %v470_v47 = vpop.f32.mrb[12].mxu1  ;;  %651 = vmatprep.mubr.bf16.mxu0 %v488_v46 }
 0x1e3   : > { %v472_v48 = vpop.f32.mrb[13].mxu1  ;;  %652 = vmatmul.mubr.bf16.vlgmr.msra.gmra.mrb[0].mxu0 %v487_v45  ;;  %v483_v50 = vmax.f32 %v470_v47, 0.0 }
 0x1e4   : > { %v474_v49 = vpop.f32.mrb[14].mxu1  ;;  %v484_v53 = vmax.f32 %v472_v48, 0.0 }
 0x1e5   : > { %v485_v51 = vmax.f32 %v474_v49, 0.0  ;;  %v476_v52 = vpop.f32.mrb[15].mxu1 }
 0x1e6   : > { %v486_v54 = vmax.f32 %v476_v52, 0.0 }
 0x1e7   : > { %v489_v55 = vpack.c.bf16 %v485_v51, %v483_v50 }
 0x1e8   : > { %v490_v56 = vpack.c.bf16 %v486_v54, %v484_v53 }
 0x1ea   : > { %659 = vmatprep.mubr.bf16.mxu0 %v490_v56 }
 0x1eb   : > { %660 = vmatmul.mubr.bf16.gmra.mrb[4].mxu0 %v489_v55 }
 0x2b6   : > { %v977_v57 = vpop.f32.mrb[0].mxu0 }
 0x2b7   : > { %v978_v58 = vpop.f32.mrb[1].mxu0 }
 0x2b8   : > { %v979_v59 = vadd.f32 %v978_v58, %v977_v57  ;;  %v980_v60 = vpop.f32.mrb[2].mxu0 }
 0x2b9   : > { %v981_v61 = vpop.f32.mrb[3].mxu0 }
 0x2ba   : > { %v982_v62 = vadd.f32 %v981_v61, %v980_v60 }
 0x2bc   : > { %v668_v63 = vpack.c.bf16 %v982_v62, %v979_v59 }
 0x2be   : > { %v983_v0 = vpop.f32.mrb[4].mxu0  ;;  %993 = vmatprep.subr.bf16.mxu1 %v668_v63 }
 0x2bf   : > { %v984_v1 = vpop.f32.mrb[5].mxu0  ;;  %994 = vmatpush3.bf16.msra.mxu1 %v668_v63 }
 0x2c0   : > { %v985_v2 = vadd.f32 %v984_v1, %v983_v0  ;;  %v986_v3 = vpop.f32.mrb[6].mxu0 }
 0x2c1   : > { %v987_v4 = vpop.f32.mrb[7].mxu0 }
 0x2c2   : > { %v988_v5 = vadd.f32 %v987_v4, %v986_v3 }
 0x2c4   : > { %v669_v6 = vpack.c.bf16 %v988_v5, %v985_v2 }
 0x2c6   : > { %995 = vmatprep.subr.bf16.mxu1 %v669_v6 }
 0x2c7   : > { %996 = vmatpush3.bf16.msra.mxu1 %v669_v6 }
 0x2ca   : > { %998 = vmatmul.mubr.msk.bf16.vlgmr.msra.gmra.mrb[16].mxu1 %vm346_vm0, %v1054_v32 }
 0x39d   : > { %v999_v7 = vpop.f32.mrb[16].mxu1 }
 0x39e   : > { %v727_v8 = vmul.f32 1.442695, %v999_v7  ;;  %v704_v9 = vpop.f32.mrb[17].mxu1 }
 0x39f   : > { %v723_v10 = vmul.f32 1.442695, %v704_v9  ;;  %v1000_v11 = vpop.f32.mrb[18].mxu1 }
 0x3a0   : > { %1071 = vpow2.f32 %v727_v8  ;;  %v729_v12 = vmul.f32 1.442695, %v1000_v11  ;;  %v707_v13 = vpop.f32.mrb[19].mxu1 }
 0x3a1   : > { %1073 = vpow2.f32 %v723_v10  ;;  %v725_v14 = vmul.f32 1.442695, %v707_v13 }
 0x3a2   : > { %1075 = vpow2.f32 %v729_v12 }
 0x3a3   : > { %1077 = vpow2.f32 %v725_v14 }
 0x3aa   : > { %v1072_v15 = vpop.eup %1071 }
 0x3ab   : > { %v1074_v16 = vpop.eup %1073  ;;  %739 = vrot.lane.b32.xlu1 %v1072_v15, %s1144_s7 }
 0x3ac   : > { %735 = vrot.lane.b32.xlu0 %v1074_v16, %s1144_s7  ;;  %v1076_v17 = vpop.eup %1075 }
 0x3ad   : > { %v1078_v18 = vpop.eup %1077 }
 0x3af   : > { %741 = vrot.lane.b32.xlu1 %v1076_v17, %s1144_s7 }
 0x3b0   : > { %737 = vrot.lane.b32.xlu0 %v1078_v18, %s1144_s7  ;;  %s1085_s7 = scalar_lea.vmem %s1084_s26, 1024 }
 0x3b1   : > { %p1087_p1 = scmp.lt.s32.totalorder %s1085_s7, %s1079_s23 }
 0x3b3   : > { %p1088_p2 = por %p1087_p1, %p1086_p0 }
 0x3b5   : > { %p1089_p3 = pnand %p1088_p2, %p1082_p13 }
 0x41d   : > { %v740_v20 = vpop.permute.xlu1 %739 }
 0x41e   : > { %v736_v22 = vpop.permute.xlu0 %735  ;;  %v749_v25 = vmul.f32 %v740_v20, %v721_v21 }
 0x41f   : > { %v747_v23 = vmul.f32 %v736_v22, %v719_v19 }
 0x420   : > { %v753_v31 = vadd.f32 %v999_v7, %v749_v25 }
 0x421   : > { %v751_v26 = vadd.f32 %v747_v23, %v704_v9  ;;  %v742_v28 = vpop.permute.xlu1 %741 }
 0x422   : > { %v738_v29 = vpop.permute.xlu0 %737  ;;  %v750_v32 = vmul.f32 %v742_v28, %v722_v27 }
 0x423   : > { %v748_v30 = vmul.f32 %v738_v29, %v720_v24  ;;  %759 = vrot.lane.b32.xlu0 %v751_v26, %s1145_s11 }
 0x424   : > { %v754_v34 = vadd.f32 %v1000_v11, %v750_v32 }
 0x425   : > { %v752_v33 = vadd.f32 %v748_v30, %v707_v13 }
 0x427   : > { %763 = vrot.lane.b32.xlu0 %v753_v31, %s1145_s11  ;;  %761 = vrot.lane.b32.xlu1 %v752_v33, %s1145_s11 }
 0x42b   : > { %765 = vrot.lane.b32.xlu1 %v754_v34, %s1145_s11 }
 0x495   : > { %v760_v35 = vpop.permute.xlu0 %759 }
 0x496   : > { %v772_v36 = vsel %vm771_vm1, %v704_v9, %v760_v35 }
 0x497   : > { %777 = vst.msk [vmem:[%s277_s12] sm:$0xff] %vm776_vm2, %v772_v36 }
 0x499   : > { %v762_v37 = vpop.permute.xlu1 %761  ;;  %v764_v38 = vpop.permute.xlu0 %763 }
 0x49a   : > { %v773_v39 = vsel %vm771_vm1, %v707_v13, %v762_v37  ;;  %v774_v40 = vsel %vm771_vm1, %v999_v7, %v764_v38 }
 0x49b   : > { %778 = vst.msk [vmem:[%s277_s12 + $0x8] sm:$0xff] %vm776_vm2, %v773_v39  ;;  %779 = vst.msk [vmem:[%s277_s12 + $0x10] sm:$0xff] %vm776_vm2, %v774_v40 }
 0x49d   : > { %v766_v41 = vpop.permute.xlu1 %765 }
 0x49e   : > { %v775_v42 = vsel %vm771_vm1, %v1000_v11, %v766_v41 }
 0x49f   : > { %780 = vst.msk [vmem:[%s277_s12 + $0x18] sm:$0xff] %vm776_vm2, %v775_v42 }
 0x4a0   : > { %1092 = shalt.err (!%p1089_p3)
}
 0x4a1   : > { %s1093_s8 = scalar_lea.hbm %s1298_s17, 512  ;;  %s1097_s11 = scalar_lea.hbm %s1348_s5, 1024 }
 0x4a2   : > { %p1094_p4 = scmp.ne.s32.totalorder %s1298_s17, %s1093_s8  ;;  %p1098_p9 = scmp.lt.u32.totalorder %s1298_s17, %s1348_s5 }
 0x4a3   : > { %p1099_p10 = scmp.lt.u32.totalorder %s1097_s11, %s1093_s8  ;;  %p1101_p12 = scmp.lt.u32.totalorder %s1093_s8, %s1298_s17 }
 0x4a4   : > { %p1095_p7 = pnand %p1094_p4, %p1217_p5 }
 0x4a5   : > { %p1100_p11 = por %p1099_p10, %p1098_p9 }
 0x4a6   : > { %p1096_p8 = pneg %p1095_p7 }
 0x4a7   : > { %p1102_p13 = por %p1101_p12, %p1100_p11 }
 0x4a9   : > { %p1103_p0 = pnand %p1102_p13, %p1096_p8 }
 0x4ab   : > { %1106 = shalt.err (!%p1103_p0)
}
 0x4ac   : > { %s1147_s12 = smov 128   ;;  %s1148_s14 = smov 8  }
 0x4ad   : > { %1001 = dma.vmem_to_hbm [thread:$0]  (%p1217_p5), %s1293_s13, 512, %s1298_s17, %s1302_s22, %s1147_s12, %s1147_s12, %s1148_s14  }
 0x4ae PF: > { %p1007_p1 = scmp.ge.s32.totalorder %s1141_s21, 2  ;;  %s810_s15 = sand.u32 1, %s1129_s18  }
 0x4af   : > { %s811_s16 = scalar_lea.sflag [#allocation3], %s810_s15 }
 0x4b0   : > { %p1004_p2 = pnand %p1007_p1, %p1221_p6 }
 0x4b2   : > { %1124 = dma.done.wait (!%p1004_p2), %s811_s16, 512  }
 0x4b3   : > { %1126 = vsyncadd (!%p1004_p2), %s811_s16, 4294966784  ;;  %p15_p3 = scmp.ge.s32.totalorder %s1204_s24, 4   ;;  %s1351_s18 = smov %s1133_s19 }
 0x4b4   : > { %s1352_s19 = smov %s1137_s20  ;;  %s1353_s20 = smov %s1215_s27 }
 0x4b5   : > { %s1354_s21 = smov %s1204_s24  ;;  %17 = sbr.rel (!%p15_p3) target bundleno = 3 (0x3), region = 87 }
 0x4bc   :  { %816 = vsyncpa [#allocation3], 1 }
 0x4bd   :  { %818 = vsyncpa [#allocation3 + $0x1], 1 }

</bundles_post_ra>
